<compile_context>
chip_gen: v6e
topology: v6e:2x2x1
jax: 0.10.0
libtpu: 0.0.40
codegen_flags: <defaults>
</compile_context>

<pallas_src>
import jax
import jax.numpy as jnp
from jax import lax
from jax.experimental import pallas as pl
from jax.experimental.pallas import tpu as pltpu


def block_kernel(patches_ref, t_ref, w_ref, b_ref, gamma_ref, beta_ref, out_ref):
    # patches_ref: (B_blk, HW, 9*Cin)   t_ref: (B_blk, 1, Cout)
    # w_ref: (9*Cin, 2*Cout)            b_ref: (1, 2*Cout)
    # gamma_ref/beta_ref: (HW, Cout)    out_ref: (B_blk, HW, Cout)
    Bb, HW, Cout = out_ref.shape
    K = patches_ref.shape[-1]

    # Both 3x3 convs as one (Bb*HW, K) @ (K, 2*Cout) matmul on the MXU.
    lhs = patches_ref[...].reshape(Bb * HW, K)
    y2 = jnp.dot(lhs, w_ref[...], preferred_element_type=jnp.float32) + b_ref[...]

    # First Cout lanes = conv_param, second Cout lanes = conv_out (128-aligned slices).
    x_param = jnp.maximum(y2[:, :Cout], 0.0).reshape(Bb, HW, Cout)
    x_out = y2[:, Cout:].reshape(Bb, HW, Cout)

    # conv_out + relu(conv_param) * relu(dense_ts(t))   (t precomputed in wrapper)
    y = x_out + x_param * t_ref[...]

    # LayerNorm over (C, H, W) per image (biased variance, eps=1e-5), then relu.
    n = HW * Cout
    mean = jnp.sum(y, axis=(1, 2), keepdims=True) / n
    centered = y - mean
    var = jnp.sum(centered * centered, axis=(1, 2), keepdims=True) / n
    y_norm = centered * lax.rsqrt(var + 1e-5)
    out = jnp.maximum(y_norm * gamma_ref[...] + beta_ref[...], 0.0)
    out_ref[...] = out.astype(out_ref.dtype)


def _pick_batch_block(B):
    """Largest divisor of B that still leaves a grid of >= 2 steps (v7x: 2 TCs)."""
    best = 1
    for cand in range(1, B + 1):
        if B % cand == 0 and B // cand >= 2:
            best = cand
    return best


def block_forward(x_img, x_ts, params):
    """x_img: (B, Cin, H, W) NCHW float32, x_ts: (B, 192). Returns NCHW (B, 128, H, W)."""
    B, Cin, H, W = x_img.shape
    Cout = 128
    HW = H * W
    K9 = 9 * Cin

    # ---- wrapper-side glue (layout + im2col + hoisted dense_ts) ----
    x_nhwc = jnp.transpose(x_img, (0, 2, 3, 1))                    # (B, H, W, Cin)
    x_pad = jnp.pad(x_nhwc, ((0, 0), (1, 1), (1, 1), (0, 0)))
    taps = [x_pad[:, dy:dy + H, dx:dx + W, :]                      # 9 x (B, H, W, Cin)
            for dy in range(3) for dx in range(3)]
    patches = jnp.concatenate(taps, axis=-1).reshape(B, HW, K9)    # (B, HW, 9*Cin)

    def conv_w(w_oihw):                                            # OIHW -> (9*Cin, Cout)
        return jnp.transpose(w_oihw, (2, 3, 1, 0)).reshape(K9, Cout)

    w_fused = jnp.concatenate([conv_w(params['wp']), conv_w(params['wo'])],
                              axis=1)                              # (9*Cin, 2*Cout)
    b_fused = jnp.concatenate([params['bp'], params['bo']]).reshape(1, 2 * Cout)

    # dense_ts hoisted: one (B,192)@(192,128) XLA matmul for the whole batch.
    t = jax.nn.relu(x_ts @ params['wts'] + params['bts']).reshape(B, 1, Cout)

    gamma = jnp.transpose(params['gamma'], (1, 2, 0)).reshape(HW, Cout)
    beta = jnp.transpose(params['beta'], (1, 2, 0)).reshape(HW, Cout)

    # ---- pallas call ----
    B_blk = _pick_batch_block(B)
    grid = (B // B_blk,)

    grid_spec = pltpu.PrefetchScalarGridSpec(
        num_scalar_prefetch=0,
        grid=grid,
        in_specs=[
            pl.BlockSpec((B_blk, HW, K9), lambda b: (b, 0, 0)),        # patches
            pl.BlockSpec((B_blk, 1, Cout), lambda b: (b, 0, 0)),       # t
            pl.BlockSpec((K9, 2 * Cout), lambda b: (0, 0)),            # fused conv weights
            pl.BlockSpec((1, 2 * Cout), lambda b: (0, 0)),             # fused conv biases
            pl.BlockSpec((HW, Cout), lambda b: (0, 0)),                # gamma
            pl.BlockSpec((HW, Cout), lambda b: (0, 0)),                # beta
        ],
        out_specs=pl.BlockSpec((B_blk, HW, Cout), lambda b: (b, 0, 0)),
    )

    out_flat = pl.pallas_call(
        block_kernel,
        out_shape=jax.ShapeDtypeStruct((B, HW, Cout), jnp.float32),
        grid_spec=grid_spec,
        compiler_params=pltpu.CompilerParams(dimension_semantics=("parallel",)),
    )(patches, t, w_fused, b_fused, gamma, beta)

    # (B, HW, Cout) -> NCHW
    return jnp.transpose(out_flat.reshape(B, H, W, Cout), (0, 3, 1, 2))


def reference(x_img, x_ts, p):
    """Pure-JAX reference mirroring the PyTorch forward (NCHW)."""
    def conv(x, w, b):
        y = lax.conv_general_dilated(x, w, (1, 1), 'SAME',
                                     dimension_numbers=('NCHW', 'OIHW', 'NCHW'))
        return y + b[None, :, None, None]
    xp = jax.nn.relu(conv(x_img, p['wp'], p['bp']))
    t = jax.nn.relu(x_ts @ p['wts'] + p['bts']).reshape(-1, 128, 1, 1)
    xo = conv(x_img, p['wo'], p['bo']) + xp * t
    mean = jnp.mean(xo, axis=(1, 2, 3), keepdims=True)
    var = jnp.mean((xo - mean) ** 2, axis=(1, 2, 3), keepdims=True)
    y = (xo - mean) / jnp.sqrt(var + 1e-5) * p['gamma'][None] + p['beta'][None]
    return jax.nn.relu(y)


if __name__ == "__main__":
    key = jax.random.PRNGKey(0)
    B, Cin, H = 2, 8, 8          # small in_channels / spatial; Cout=128 fixed by the module
    Cout = 128
    ks = jax.random.split(key, 10)
    scale = 0.05

    x_img = jax.random.normal(ks[0], (B, Cin, H, H), jnp.float32)
    x_ts = jax.random.normal(ks[1], (B, 192), jnp.float32)

    params = dict(
        wp=jax.random.normal(ks[2], (Cout, Cin, 3, 3), jnp.float32) * scale,   # conv_param.weight (OIHW)
        bp=jax.random.normal(ks[3], (Cout,), jnp.float32) * scale,             # conv_param.bias
        wo=jax.random.normal(ks[4], (Cout, Cin, 3, 3), jnp.float32) * scale,   # conv_out.weight
        bo=jax.random.normal(ks[5], (Cout,), jnp.float32) * scale,             # conv_out.bias
        wts=jax.random.normal(ks[6], (192, Cout), jnp.float32) * scale,        # dense_ts.weight.T
        bts=jax.random.normal(ks[7], (Cout,), jnp.float32) * scale,            # dense_ts.bias
        gamma=jax.random.normal(ks[8], (Cout, H, H), jnp.float32) * 0.1 + 1.0, # layer_norm.weight
        beta=jax.random.normal(ks[9], (Cout, H, H), jnp.float32) * 0.1,        # layer_norm.bias
    )

    out = jax.block_until_ready(block_forward(x_img, x_ts, params))
    ref = reference(x_img, x_ts, params)
    assert out.shape == (B, Cout, H, H)
    assert jnp.allclose(out, ref, atol=1e-4, rtol=1e-4), float(jnp.max(jnp.abs(out - ref)))
    print("KERNEL_OK")
</pallas_src>

<mosaic_0001>
module attributes {stable_mosaic.version = 11 : i64} {
  func.func @block_kernel(%arg0: i32, %arg1: memref<1x64x72xf32, #tpu.memory_space<vmem>>, %arg2: memref<1x1x128xf32, #tpu.memory_space<vmem>>, %arg3: memref<72x256xf32, #tpu.memory_space<vmem>>, %arg4: memref<1x256xf32, #tpu.memory_space<vmem>>, %arg5: memref<64x128xf32, #tpu.memory_space<vmem>>, %arg6: memref<64x128xf32, #tpu.memory_space<vmem>>, %arg7: memref<1x64x128xf32, #tpu.memory_space<vmem>>) attributes {dimension_semantics = [#tpu.dimension_semantics<parallel>], iteration_bounds = array<i64: 2>, scalar_prefetch = 0 : i64, scratch_operands = 0 : i64, tpu.core_type = #tpu.core_type<tc>, window_params = [{transform_indices = @transform_0, window_bounds = array<i64: 1, 64, 72>}, {transform_indices = @transform_1, window_bounds = array<i64: 1, 1, 128>}, {pipeline_mode = #tpu.pipeline_mode<synchronous>, transform_indices = @transform_2, window_bounds = array<i64: 72, 256>}, {pipeline_mode = #tpu.pipeline_mode<synchronous>, transform_indices = @transform_3, window_bounds = array<i64: 1, 256>}, {pipeline_mode = #tpu.pipeline_mode<synchronous>, transform_indices = @transform_4, window_bounds = array<i64: 64, 128>}, {pipeline_mode = #tpu.pipeline_mode<synchronous>, transform_indices = @transform_5, window_bounds = array<i64: 64, 128>}, {transform_indices = @transform_6, window_bounds = array<i64: 1, 64, 128>}]} {
    %c0 = arith.constant 0 : index
    %c0_0 = arith.constant 0 : index
    %c0_1 = arith.constant 0 : index
    %0 = vector.load %arg1[%c0, %c0_0, %c0_1] : memref<1x64x72xf32, #tpu.memory_space<vmem>>, vector<1x64x72xf32>
    %1 = vector.shape_cast %0 : vector<1x64x72xf32> to vector<64x72xf32>
    %c0_2 = arith.constant 0 : index
    %c0_3 = arith.constant 0 : index
    %2 = vector.load %arg3[%c0_2, %c0_3] : memref<72x256xf32, #tpu.memory_space<vmem>>, vector<72x256xf32>
    %cst = arith.constant dense<0.000000e+00> : vector<64x256xf32>
    %3 = tpu.matmul %1, %2, %cst {dimension_numbers = #tpu.dot_dimension_numbers<[1], [0], [0], [1], [0, 0, 1, 1], [], []>} : vector<64x72xf32>, vector<72x256xf32>, vector<64x256xf32> -> vector<64x256xf32>
    %c0_4 = arith.constant 0 : index
    %c0_5 = arith.constant 0 : index
    %4 = vector.load %arg4[%c0_4, %c0_5] : memref<1x256xf32, #tpu.memory_space<vmem>>, vector<1x256xf32>
    %5 = vector.broadcast %4 : vector<1x256xf32> to vector<64x256xf32>
    %6 = arith.addf %3, %5 : vector<64x256xf32>
    %7 = vector.extract_strided_slice %6 {offsets = [0, 0], sizes = [64, 128], strides = [1, 1]} : vector<64x256xf32> to vector<64x128xf32>
    %cst_6 = arith.constant 0.000000e+00 : f32
    %8 = vector.broadcast %cst_6 : f32 to vector<64x128xf32>
    %9 = arith.maximumf %7, %8 : vector<64x128xf32>
    %10 = vector.shape_cast %9 : vector<64x128xf32> to vector<1x64x128xf32>
    %11 = vector.extract_strided_slice %6 {offsets = [0, 128], sizes = [64, 128], strides = [1, 1]} : vector<64x256xf32> to vector<64x128xf32>
    %12 = vector.shape_cast %11 : vector<64x128xf32> to vector<1x64x128xf32>
    %c0_7 = arith.constant 0 : index
    %c0_8 = arith.constant 0 : index
    %c0_9 = arith.constant 0 : index
    %13 = vector.load %arg2[%c0_7, %c0_8, %c0_9] : memref<1x1x128xf32, #tpu.memory_space<vmem>>, vector<1x1x128xf32>
    %14 = vector.broadcast %13 : vector<1x1x128xf32> to vector<1x64x128xf32>
    %15 = arith.mulf %10, %14 : vector<1x64x128xf32>
    %16 = arith.addf %12, %15 : vector<1x64x128xf32>
    %cst_10 = arith.constant dense<0.000000e+00> : vector<1xf32>
    %17 = vector.multi_reduction <add>, %16, %cst_10 [1, 2] : vector<1x64x128xf32> to vector<1xf32>
    %18 = vector.shape_cast %17 : vector<1xf32> to vector<1x1x1xf32>
    %cst_11 = arith.constant 8.192000e+03 : f32
    %19 = vector.broadcast %cst_11 : f32 to vector<1x1x1xf32>
    %20 = arith.divf %18, %19 : vector<1x1x1xf32>
    %21 = vector.broadcast %20 : vector<1x1x1xf32> to vector<1x64x128xf32>
    %22 = arith.subf %16, %21 : vector<1x64x128xf32>
    %23 = arith.mulf %22, %22 : vector<1x64x128xf32>
    %cst_12 = arith.constant dense<0.000000e+00> : vector<1xf32>
    %24 = vector.multi_reduction <add>, %23, %cst_12 [1, 2] : vector<1x64x128xf32> to vector<1xf32>
    %25 = vector.shape_cast %24 : vector<1xf32> to vector<1x1x1xf32>
    %cst_13 = arith.constant 8.192000e+03 : f32
    %26 = vector.broadcast %cst_13 : f32 to vector<1x1x1xf32>
    %27 = arith.divf %25, %26 : vector<1x1x1xf32>
    %cst_14 = arith.constant 9.99999974E-6 : f32
    %28 = vector.broadcast %cst_14 : f32 to vector<1x1x1xf32>
    %29 = arith.addf %27, %28 : vector<1x1x1xf32>
    %30 = math.rsqrt %29 : vector<1x1x1xf32>
    %31 = vector.broadcast %30 : vector<1x1x1xf32> to vector<1x64x128xf32>
    %32 = arith.mulf %22, %31 : vector<1x64x128xf32>
    %c0_15 = arith.constant 0 : index
    %c0_16 = arith.constant 0 : index
    %33 = vector.load %arg5[%c0_15, %c0_16] : memref<64x128xf32, #tpu.memory_space<vmem>>, vector<64x128xf32>
    %34 = vector.shape_cast %33 : vector<64x128xf32> to vector<1x64x128xf32>
    %35 = arith.mulf %32, %34 : vector<1x64x128xf32>
    %c0_17 = arith.constant 0 : index
    %c0_18 = arith.constant 0 : index
    %36 = vector.load %arg6[%c0_17, %c0_18] : memref<64x128xf32, #tpu.memory_space<vmem>>, vector<64x128xf32>
    %37 = vector.shape_cast %36 : vector<64x128xf32> to vector<1x64x128xf32>
    %38 = arith.addf %35, %37 : vector<1x64x128xf32>
    %cst_19 = arith.constant 0.000000e+00 : f32
    %39 = vector.broadcast %cst_19 : f32 to vector<1x64x128xf32>
    %40 = arith.maximumf %38, %39 : vector<1x64x128xf32>
    %c0_20 = arith.constant 0 : index
    %c0_21 = arith.constant 0 : index
    %c0_22 = arith.constant 0 : index
    %41 = vector.load %arg7[%c0_20, %c0_21, %c0_22] : memref<1x64x128xf32, #tpu.memory_space<vmem>>, vector<1x64x128xf32>
    tpu.vector_store %arg7[%c0_20, %c0_21, %c0_22], %40 {strides = array<i32>} : memref<1x64x128xf32, #tpu.memory_space<vmem>>, vector<1x64x128xf32>,
    return
  }
  func.func @transform_0(%arg0: i32) -> (i32, i32, i32) {
    %c0_i32 = arith.constant 0 : i32
    %c0_i32_0 = arith.constant 0 : i32
    %c0_i32_1 = arith.constant 0 : i32
    return %arg0, %c0_i32, %c0_i32_0 : i32, i32, i32
  }
  func.func @transform_1(%arg0: i32) -> (i32, i32, i32) {
    %c0_i32 = arith.constant 0 : i32
    %c0_i32_0 = arith.constant 0 : i32
    %c0_i32_1 = arith.constant 0 : i32
    return %arg0, %c0_i32, %c0_i32_0 : i32, i32, i32
  }
  func.func @transform_2(%arg0: i32) -> (i32, i32) {
    %c0_i32 = arith.constant 0 : i32
    %c0_i32_0 = arith.constant 0 : i32
    %c0_i32_1 = arith.constant 0 : i32
    return %c0_i32, %c0_i32_0 : i32, i32
  }
  func.func @transform_3(%arg0: i32) -> (i32, i32) {
    %c0_i32 = arith.constant 0 : i32
    %c0_i32_0 = arith.constant 0 : i32
    %c0_i32_1 = arith.constant 0 : i32
    return %c0_i32, %c0_i32_0 : i32, i32
  }
  func.func @transform_4(%arg0: i32) -> (i32, i32) {
    %c0_i32 = arith.constant 0 : i32
    %c0_i32_0 = arith.constant 0 : i32
    %c0_i32_1 = arith.constant 0 : i32
    return %c0_i32, %c0_i32_0 : i32, i32
  }
  func.func @transform_5(%arg0: i32) -> (i32, i32) {
    %c0_i32 = arith.constant 0 : i32
    %c0_i32_0 = arith.constant 0 : i32
    %c0_i32_1 = arith.constant 0 : i32
    return %c0_i32, %c0_i32_0 : i32, i32
  }
  func.func @transform_6(%arg0: i32) -> (i32, i32, i32) {
    %c0_i32 = arith.constant 0 : i32
    %c0_i32_0 = arith.constant 0 : i32
    %c0_i32_1 = arith.constant 0 : i32
    return %arg0, %c0_i32, %c0_i32_0 : i32, i32, i32
  }
}

</mosaic_0001>

<bundles_post_ra>
// kernel: tpu_custom_call.1
= control target key start
LH: loop header
LB: loop body
LE: loop exit
PB: predicated region body
PF: predicated region fallthrough
CT: control target
= control target key end

     0   :  { %s1484_s0 = inlined_call_operand.hbm [shape: f32[2,64,72], index: 0, kind: input, shape index: {}]   ;;  %s1485_s1 = inlined_call_operand.hbm [shape: f32[2,1,128], index: 1, kind: input, shape index: {}]   ;;  %s1486_s2 = inlined_call_operand.hbm [shape: f32[72,256], index: 2, kind: input, shape index: {}]   ;;  %s1487_s3 = inlined_call_operand.vmem [shape: f32[1,256], index: 3, kind: input, shape index: {}]   ;;  %s1488_s4 = inlined_call_operand.hbm [shape: f32[64,128], index: 4, kind: input, shape index: {}]   ;;  %s1489_s5 = inlined_call_operand.hbm [shape: f32[64,128], index: 5, kind: input, shape index: {}]   ;;  %s1490_s6 = inlined_call_operand.hbm [shape: f32[2,64,128], index: 6, kind: output, shape index: {}]  }
   0x1   :  { %1496 = sst [smem:[#allocation17_spill]] %s1484_s0 }
   0x2   :  { %1497 = sst [smem:[#allocation18_spill]] %s1486_s2 }
   0x3   :  { %1498 = sst [smem:[#allocation19_spill]] %s1488_s4 }
   0x4   :  { %11 = vsyncpa [#allocation3], 0 }
   0x5   :  { %13 = vsyncpa [#allocation3 + $0x1], 0 }
   0x6   :  { %14 = vsyncpa [#allocation6], 0 }
   0x7   :  { %16 = vsyncpa [#allocation6 + $0x1], 0 }
   0x8   :  { %17 = vsyncpa [#allocation9], 0 }
   0x9   :  { %18 = vsyncpa [#allocation4], 0 }
   0xa   :  { %20 = vsyncpa [#allocation4 + $0x1], 0  ;;  %s1197_s21 = smov 0   ;;  %s1199_s22 = smov 0  }
   0xb   :  { %s1201_s23 = smov 0   ;;  %s1203_s24 = smov 0  }
   0xc LB: > { %s1218_s25 = sadd.s32 4294967295, %s1147_s24   ;;  %s796_s26 = sadd.s32 4294967294, %s1147_s24   ;;  %s1147_s24 = sphi %s1203_s24, %s1524_s24   ;;  %s1143_s23 = sphi %s1201_s23, %s1523_s23   ;;  %s1139_s22 = sphi %s1199_s22, %s1522_s22   ;;  %s1135_s21 = sphi %s1197_s21, %s1521_s21  }
   0xd   : > { %p46_p0 = scmp.ne.s32.totalorder %s1139_s22, %s1135_s21  ;;  %p1491_p1 = scmp.eq.s32.totalorder %s1218_s25, 0 }
   0xe   : > { %p186_p3 = scmp.eq.s32.totalorder %s796_s26, 1  ;;  %p797_p5 = scmp.ge.s32.totalorder %s1147_s24, 1 }
   0xf   : > { %p1227_p4 = por %p1491_p1, %p46_p0  ;;  %p193_p7 = scmp.lt.s32.totalorder %s1147_s24, 3 }
  0x10   : > { %p1232_p6 = por %p186_p3, %p46_p0  ;;  %s1149_s30 = smov [#allocation7]  }
  0x11   : > { %s1499_s27 = scalar_select %p1227_p4, 1, 0 }
  0x12   : > { %s1500_s28 = scalar_select %p1232_p6, 1, 0 }
  0x13   : > { %p1237_p8 = pnand %p797_p5, %p193_p7  ;;  %s205_s7 = sshll.u32 %s1149_s30, 4  ;;  %s206_s7 = int_to_ptr.vmem [resolvable:$true] %s205_s7 }
  0x14   : > { %s1150_s9 = smov [#allocation8]   ;;  %s948_s11 = scalar_lea.vmem %s206_s7, 2304 }
  0x15   : > { %s1501_s29 = scalar_select %p1237_p8, 1, 0 }
  0x16   : > { %p864_p9 = pneg %p1237_p8  ;;  %s221_s10 = sshll.u32 %s1150_s9, 4  ;;  %s222_s10 = int_to_ptr.vmem [resolvable:$true] %s221_s10 }
  0x17   : > { %p949_p13 = scmp.ne.s32.totalorder %s206_s7, %s948_s11  ;;  %p956_p5 = scmp.lt.s32.totalorder %s206_s7, %s206_s7 }
  0x18   : > { %p1246_p11 = pnand %p864_p9, %p1491_p1  ;;  %p957_p7 = scmp.lt.s32.totalorder %s948_s11, %s948_s11 }
  0x1a   : > { %p939_p12 = pneg %p1246_p11  ;;  %p958_p10 = por %p957_p7, %p956_p5 }
  0x1c   : > { %p951_p0 = pnand %p949_p13, %p939_p12 }
  0x1e   : > { %p952_p3 = pneg %p951_p0 }
  0x20   : > { %p959_p9 = pnand %p958_p10, %p952_p3 }
  0x22   : > { %962 = shalt.err (!%p959_p9)
}
  0x23   : > { %s1151_s12 = smov 256   ;;  %s1152_s13 = smov 16  }
  0x24   : > { %s1503_s2 = sld [smem:[#allocation18_spill]]  ;;  %s974_s16 = scalar_lea.vmem %s222_s10, 1024 }
  0x25   : > { %p975_p1 = scmp.ne.s32.totalorder %s222_s10, %s974_s16  ;;  %p982_p2 = scmp.lt.s32.totalorder %s222_s10, %s222_s10 }
  0x26   : > { %p983_p6 = scmp.lt.s32.totalorder %s974_s16, %s974_s16 }
  0x27   : > { %p977_p13 = pnand %p975_p1, %p939_p12 }
  0x28   : > { %p984_p5 = por %p983_p6, %p982_p2 }
  0x29   : > { %p978_p0 = pneg %p977_p13 }
  0x2a   : > { %867 = dma.hbm_to_vmem [thread:$0]  (!%p1246_p11), %s1503_s2, 2304, %s206_s7, [#allocation6], %s1151_s12, %s1151_s12, %s1152_s13  }
  0x2b   : > { %p985_p10 = pnand %p984_p5, %p978_p0 }
  0x2d   : > { %988 = shalt.err (!%p985_p10)
}
  0x2e   : > { %s1492_s17 = smov 128   ;;  %s1154_s18 = smov 8  }
  0x2f   : > { %s1504_s4 = sld [smem:[#allocation19_spill]]  ;;  %s1155_s26 = smov [#allocation10]  }
  0x30   : > { %s234_s30 = sshll.u32 %s1155_s26, 4  ;;  %s1272_s7 = sadd.s32 1, %s1147_s24   ;;  %s235_s30 = int_to_ptr.vmem [resolvable:$true] %s234_s30 }
  0x31   : > { %s1000_s9 = scalar_lea.vmem %s235_s30, 1024  ;;  %p1008_p3 = scmp.lt.s32.totalorder %s235_s30, %s235_s30 }
  0x32   : > { %p1001_p1 = scmp.ne.s32.totalorder %s235_s30, %s1000_s9  ;;  %p1009_p7 = scmp.lt.s32.totalorder %s1000_s9, %s1000_s9 }
  0x34   : > { %p1003_p2 = pnand %p1001_p1, %p939_p12  ;;  %p1010_p9 = por %p1009_p7, %p1008_p3 }
  0x35   : > { %870 = dma.hbm_to_vmem [thread:$0]  (!%p1246_p11), %s1504_s4, 1024, %s222_s10, [#allocation9], %s1492_s17, %s1492_s17, %s1154_s18  }
  0x36   : > { %p1004_p6 = pneg %p1003_p2 }
  0x38   : > { %p1011_p13 = pnand %p1010_p9, %p1004_p6 }
  0x3a   : > { %1014 = shalt.err (!%p1011_p13)
}
  0x3b   : > { %873 = dma.hbm_to_vmem [thread:$0]  (!%p1246_p11), %s1489_s5, 1024, %s235_s30, [#allocation9], %s1492_s17, %s1492_s17, %s1154_s18  }
  0x3c   : > { %s30_s12 = ssub.s32 %s1147_s24, %s1272_s7  ;;  %s33_s8 = sadd.s32 1, %s1143_s23 }
  0x3d   : > { %p31_p12 = scmp.eq.s32.totalorder %s30_s12, 0  ;;  %p40_p0 = scmp.ne.s32.totalorder %s1143_s23, %s1139_s22 }
  0x3e   : > { %p41_p5 = scmp.eq.s32.totalorder %s1147_s24, 0  ;;  %p888_p10 = scmp.lt.s32.totalorder %s1147_s24, 2 }
  0x3f   : > { %s1293_s13 = scalar_select %p31_p12, %s1143_s23, %s33_s8  }
  0x40   : > { %p42_p1 = por %p41_p5, %p40_p0  ;;  %p1505_p2 = scmp.eq.s32.totalorder %s1218_s25, 1 }
  0x41   : > { %s1302_s15 = sand.u32 1, %s1143_s23   ;;  %s826_s16 = sshll.u32 %s1147_s24, 10 }
  0x42   : > { %p1297_p6 = por %p1505_p2, %p40_p0  ;;  %s802_s19 = sshll.u32 %s1302_s15, 6 }
  0x43   : > { %s1507_s0 = sld [smem:[#allocation17_spill]]  ;;  %s252_s9 = scalar_lea.vmem [#allocation2], %s802_s19 }
  0x44   : > { %s1506_s14 = scalar_select %p1297_p6, 1, 0 }
  0x45   : > { %s259_s10 = sshll.u32 %s252_s9, 4  ;;  %p1311_p11 = pnand %p888_p10, %p42_p1  ;;  %s1315_s10 = int_to_ptr.vmem [resolvable:$true] %s259_s10 }
  0x47   : > { %p1017_p7 = pneg %p1311_p11 }
  0x49   : > { %s1309_s30 = scalar_lea.hbm %s1507_s0, %s826_s16  ;;  %s1020_s20 = scalar_lea.hbm %s1507_s0, 2048 }
  0x4a   : > { %s1015_s17 = scalar_lea.hbm %s1309_s30, 1024  ;;  %p1021_p12 = scmp.lt.s32.totalorder %s1309_s30, %s1507_s0 }
  0x4b   : > { %p1016_p3 = scmp.ne.s32.totalorder %s1309_s30, %s1015_s17  ;;  %p1022_p0 = scmp.lt.s32.totalorder %s1020_s20, %s1015_s17 }
  0x4d   : > { %p1018_p9 = pnand %p1017_p7, %p1016_p3  ;;  %p1023_p5 = por %p1022_p0, %p1021_p12 }
  0x4f   : > { %p1019_p13 = pneg %p1018_p9 }
  0x51   : > { %p1024_p10 = pnand %p1023_p5, %p1019_p13 }
  0x53   : > { %1027 = shalt.err (!%p1024_p10)
}
  0x54   : > { %s1028_s12 = scalar_lea.vmem %s1315_s10, 1024  ;;  %s1156_s16 = smov [#allocation2]  }
  0x55   : > { %p1029_p1 = scmp.ne.s32.totalorder %s1315_s10, %s1028_s12  ;;  %s1033_s19 = sshll.u32 %s1156_s16, 4  ;;  %s1034_s19 = int_to_ptr.vmem [resolvable:$false] %s1033_s19 }
  0x56   : > { %s1035_s8 = scalar_lea.vmem %s1034_s19, 2048  ;;  %p1036_p9 = scmp.lt.s32.totalorder %s1315_s10, %s1034_s19 }
  0x57   : > { %p1031_p2 = pnand %p1029_p1, %p1017_p7  ;;  %p1037_p6 = scmp.lt.s32.totalorder %s1035_s8, %s1028_s12 }
  0x59   : > { %p1032_p3 = pneg %p1031_p2  ;;  %p1038_p4 = por %p1037_p6, %p1036_p9 }
  0x5b   : > { %p1039_p12 = pnand %p1038_p4, %p1032_p3 }
  0x5d   : > { %1042 = shalt.err (!%p1039_p12)
}
  0x5e   : > { %s1509_s17 = smov 128   ;;  %s1510_s20 = scalar_lea.sflag [#allocation3], %s1302_s15 }
  0x5f   : > { %877 = dma.hbm_to_vmem [thread:$0]  (!%p1311_p11), %s1309_s30, 1024, %s1315_s10, %s1510_s20, %s1509_s17, %s1509_s17, %s1154_s18  }
  0x60   : > { %s805_s26 = sshll.u32 %s1147_s24, 4  ;;  %s272_s16 = scalar_lea.vmem [#allocation5], %s1302_s15 }
  0x61   : > { %s1352_s8 = scalar_lea.hbm %s1485_s1, %s805_s26  ;;  %s279_s19 = sshll.u32 %s272_s16, 4  ;;  %s280_s19 = int_to_ptr.vmem [resolvable:$true] %s279_s19 }
  0x62   : > { %s1511_s0 = sand.u32 1, %s1147_s24   ;;  %s1043_s4 = scalar_lea.hbm %s1352_s8, 16 }
  0x63   : > { %s270_s2 = scalar_lea.sflag [#allocation6], %s1511_s0  ;;  %p1044_p4 = scmp.ne.s32.totalorder %s1352_s8, %s1043_s4 }
  0x64   : > { %s1048_s10 = scalar_lea.hbm %s1485_s1, 32  ;;  %p1049_p0 = scmp.lt.s32.totalorder %s1352_s8, %s1485_s1 }
  0x65   : > { %p1046_p6 = pnand %p1044_p4, %p1017_p7  ;;  %p1050_p5 = scmp.lt.s32.totalorder %s1048_s10, %s1043_s4 }
  0x67   : > { %p1047_p13 = pneg %p1046_p6  ;;  %p1051_p10 = por %p1050_p5, %p1049_p0 }
  0x69   : > { %p1052_p1 = pnand %p1051_p10, %p1047_p13 }
  0x6b   : > { %1055 = shalt.err (!%p1052_p1)
}
  0x6c   : > { %s1056_s15 = scalar_lea.vmem %s280_s19, 16  ;;  %s1157_s0 = smov [#allocation5]  }
  0x6d   : > { %p1057_p2 = scmp.ne.s32.totalorder %s280_s19, %s1056_s15  ;;  %s1061_s26 = sshll.u32 %s1157_s0, 4  ;;  %s1062_s26 = int_to_ptr.vmem [resolvable:$false] %s1061_s26 }
  0x6e   : > { %s1063_s9 = scalar_lea.vmem %s1062_s26, 32  ;;  %p1064_p12 = scmp.lt.s32.totalorder %s280_s19, %s1062_s26 }
  0x6f   : > { %p1059_p3 = pnand %p1057_p2, %p1017_p7  ;;  %p1065_p4 = scmp.lt.s32.totalorder %s1063_s9, %s1056_s15 }
  0x71   : > { %p1060_p9 = pneg %p1059_p3  ;;  %p1066_p6 = por %p1065_p4, %p1064_p12 }
  0x73   : > { %p1067_p8 = pnand %p1066_p6, %p1060_p9 }
  0x75   : > { %1070 = shalt.err (!%p1067_p8)
}
  0x76   : > { %880 = dma.hbm_to_vmem [thread:$0]  (!%p1311_p11), %s1352_s8, 16, %s280_s19, %s270_s2  }
  0x77   : > { %p1512_p13 = scmp.ne.s32.totalorder %s1501_s29, 0 }
  0x78   : > { %s1378_s4 = sand.u32 (!%p1512_p13), 1, %s1139_s22   ;;  %p1513_p8 = scmp.ne.s32.totalorder (!%p1512_p13), %s1499_s27, 0 }
  0x79   : > { %288 = sbr.rel (%p1512_p13) target bundleno = 743 (0x2e7), region = 44  ;;  %s807_s12 = sshll.u32 (!%p1512_p13), %s1378_s4, 6 }
  0x7a   : > { %s291_s16 = scalar_lea.sflag (!%p1512_p13), [#allocation3], %s1378_s4  ;;  %s1384_s18 = scalar_lea.vmem (!%p1512_p13), [#allocation2], %s807_s12 }
  0x7e   : > { %1114 = dma.done.wait (%p1513_p8), %s291_s16, 1024  }
  0x7f   : > { %1116 = vsyncadd (%p1513_p8), %s291_s16, 4294966272  ;;  %s299_s2 = sand.u32 1, %s1218_s25   ;;  %s302_s11 = scalar_lea.vmem [#allocation5], %s1378_s4 }
  0x80   : > { %s300_s29 = scalar_lea.sflag [#allocation6], %s299_s2 }
  0x81   : > { %1118 = dma.done.wait (%p1513_p8), %s300_s29, 16  }
  0x82   : > { %1120 = vsyncadd (%p1513_p8), %s300_s29, 4294967280  ;;  %p1514_p11 = scmp.eq.s32.totalorder %s1218_s25, 0 }
  0x84   : > { %1122 = dma.done.wait (%p1514_p11), [#allocation6], 2304   ;;  %p1515_p7 = pmov %p1514_p11 }
  0x86   : > { %1124 = vsyncadd (%p1515_p7), [#allocation6], 4294964992  ;;  %p1516_p0 = pmov %p1515_p7 }
  0x88   : > { %1126 = dma.done.wait (%p1516_p0), [#allocation9], 2048   ;;  %p1517_p5 = pmov %p1516_p0 }
  0x89   : > { %v1158_v0 = vmov 0.0   ;;  %v372_v1 = vld [vmem:[#allocation7 + $0x88] sm:$0xff]  ;;  %v371_v2 = vld [vmem:[#allocation7 + $0x80] sm:$0xff]  ;;  %v370_v3 = vld [vmem:[#allocation7 + $0x78] sm:$0xff]  ;;  %vm385_vm0 = vcmask 588800   ;;  %v375_v27 = vlaneseq  ;;  %s827_s19 = sshll.u32 %s1218_s25, 10 }
  0x8a   : > { %1128 = vsyncadd (%p1517_p5), [#allocation9], 4294965248  ;;  %474 = vmatprep.mubr.f32.mxu0 %v1158_v0  ;;  %498 = vmatprep.mubr.f32.mxu1 %v1158_v0  ;;  %v369_v4 = vld [vmem:[#allocation7 + $0x70] sm:$0xff]  ;;  %v368_v5 = vld [vmem:[#allocation7 + $0x68] sm:$0xff]  ;;  %s346_s30 = scalar_lea.vmem [#allocation11], %s807_s12  ;;  %s1439_s25 = scalar_lea.hbm %s1490_s6, %s827_s19 }
  0x8b   : > { %424 = vmatprep.subr.mxu0 %v372_v1  ;;  %828 = vmatprep.subr.mxu1 %v372_v1  ;;  %v367_v6 = vld [vmem:[#allocation7 + $0x60] sm:$0xff]  ;;  %v366_v7 = vld [vmem:[#allocation7 + $0x58] sm:$0xff]  ;;  %v365_v8 = vld [vmem:[#allocation7 + $0x50] sm:$0xff]  ;;  %v376_v28 = vshrl.u32 %v375_v27, 7  ;;  %s675_s10 = sshll.u32 %s346_s30, 4  ;;  %s662_s15 = scalar_lea.sflag [#allocation4], %s1378_s4  ;;  %s1441_s10 = int_to_ptr.vmem [resolvable:$true] %s675_s10 }
  0x8c   : > { %425 = vmatpush1.msra.mxu0 %v371_v2  ;;  %837 = vmatpush1.msra.mxu1 %v371_v2  ;;  %v364_v9 = vld [vmem:[#allocation7 + $0x48] sm:$0xff]  ;;  %v363_v10 = vld [vmem:[#allocation7 + $0x40] sm:$0xff]  ;;  %v362_v11 = vld [vmem:[#allocation7 + $0x38] sm:$0xff]  ;;  %s1071_s0 = scalar_lea.vmem %s1441_s10, 1024  ;;  %p1518_p1 = scmp.ne.s32.totalorder %s1506_s14, 0 }
  0x8d   : > { %426 = vmatprep.subr.mxu0 %v370_v3  ;;  %829 = vmatprep.subr.mxu1 %v370_v3  ;;  %v361_v12 = vld [vmem:[#allocation7 + $0x30] sm:$0xff]  ;;  %v360_v13 = vld [vmem:[#allocation7 + $0x28] sm:$0xff]  ;;  %v359_v14 = vld [vmem:[#allocation7 + $0x20] sm:$0xff]  ;;  %v377_v29 = vsub.s32 0, %v376_v28  ;;  %v381_v37 = vsub.s32 1, %v376_v28  ;;  %p1072_p10 = scmp.ne.s32.totalorder %s1441_s10, %s1071_s0  ;;  %s1159_s26 = smov [#allocation11]  }
  0x8e   : > { %427 = vmatpush1.msra.mxu0 %v369_v4  ;;  %838 = vmatpush1.msra.mxu1 %v369_v4  ;;  %v358_v15 = vld [vmem:[#allocation7 + $0x18] sm:$0xff]  ;;  %v357_v16 = vld [vmem:[#allocation7 + $0x10] sm:$0xff]  ;;  %v356_v17 = vld [vmem:[#allocation7 + $0x8] sm:$0xff]  ;;  %s1075_s9 = sshll.u32 %s1159_s26, 4  ;;  %s1076_s9 = int_to_ptr.vmem [resolvable:$false] %s1075_s9 }
  0x8f   : > { %428 = vmatprep.subr.mxu0 %v368_v5  ;;  %830 = vmatprep.subr.mxu1 %v368_v5  ;;  %v355_v18 = vld [vmem:[#allocation7] sm:$0xff]  ;;  %v349_v23 = vld [vmem:[%s1384_s18 + $0x10] sm:$0xff]  ;;  %v350_v25 = vld [vmem:[%s1384_s18 + $0x18] sm:$0xff]  ;;  %p1073_p2 = pnand %p1072_p10, %p1518_p1  ;;  %s1077_s12 = scalar_lea.vmem %s1076_s9, 2048 }
  0x90   : > { %429 = vmatpush1.msra.mxu0 %v367_v6  ;;  %839 = vmatpush1.msra.mxu1 %v367_v6  ;;  %v347_v19 = vld [vmem:[%s1384_s18] sm:$0xff]  ;;  %v348_v21 = vld [vmem:[%s1384_s18 + $0x8] sm:$0xff]  ;;  %v353_v24 = vld [vmem:[%s1384_s18 + $0x30] sm:$0xff]  ;;  %p1078_p9 = scmp.lt.s32.totalorder %s1441_s10, %s1076_s9  ;;  %p1079_p12 = scmp.lt.s32.totalorder %s1077_s12, %s1071_s0 }
  0x91   : > { %430 = vmatprep.subr.mxu0 %v366_v7  ;;  %831 = vmatprep.subr.mxu1 %v366_v7  ;;  %v351_v20 = vld [vmem:[%s1384_s18 + $0x20] sm:$0xff]  ;;  %v352_v22 = vld [vmem:[%s1384_s18 + $0x28] sm:$0xff]  ;;  %v354_v26 = vld [vmem:[%s1384_s18 + $0x38] sm:$0xff]  ;;  %p1074_p3 = pneg %p1073_p2 }
  0x92   : > { %431 = vmatpush1.msra.mxu0 %v365_v8  ;;  %840 = vmatpush1.msra.mxu1 %v365_v8  ;;  %v373_v30 = vld [vmem:[%s1487_s3] sm:$0x3]  ;;  %p1080_p4 = por %p1079_p12, %p1078_p9 }
  0x93   : > { %432 = vmatprep.subr.mxu0 %v364_v9  ;;  %832 = vmatprep.subr.mxu1 %v364_v9  ;;  %v378_v31 = vrot.slane %v373_v30, %v377_v29  ;;  %v820_v44 = vld [vmem:[%s302_s11] ss:$0 sm:$0xff]  ;;  %v382_v46 = vrot.slane %v373_v30, %v381_v37 }
  0x94   : > { %433 = vmatpush1.msra.mxu0 %v363_v10  ;;  %841 = vmatpush1.msra.mxu1 %v363_v10  ;;  %p1081_p6 = pnand %p1080_p4, %p1074_p3 }
  0x95   : > { %434 = vmatprep.subr.mxu0 %v362_v11  ;;  %833 = vmatprep.subr.mxu1 %v362_v11 }
  0x96   : > { %435 = vmatpush1.msra.mxu0 %v361_v12  ;;  %842 = vmatpush1.msra.mxu1 %v361_v12 }
  0x97   : > { %436 = vmatprep.subr.mxu0 %v360_v13  ;;  %834 = vmatprep.subr.mxu1 %v360_v13 }
  0x98   : > { %437 = vmatpush1.msra.mxu0 %v359_v14  ;;  %843 = vmatpush1.msra.mxu1 %v359_v14 }
  0x99   : > { %438 = vmatprep.subr.mxu0 %v358_v15  ;;  %835 = vmatprep.subr.mxu1 %v358_v15 }
  0x9a   : > { %439 = vmatpush1.msra.mxu0 %v357_v16  ;;  %844 = vmatpush1.msra.mxu1 %v357_v16 }
  0x9b   : > { %440 = vmatprep.subr.mxu0 %v356_v17  ;;  %836 = vmatprep.subr.mxu1 %v356_v17 }
  0x9c   : > { %441 = vmatpush1.msra.mxu0 %v355_v18  ;;  %845 = vmatpush1.msra.mxu1 %v355_v18 }
  0x9d   : > { %812 = vmatmul.mubr.msk.f32.vlgmr.msra.gmra.mxu0 %vm385_vm0, %v347_v19  ;;  %816 = vmatmul.mubr.msk.f32.vlgmr.msra.gmra.mxu1 %vm385_vm0, %v351_v20 }
  0x9e   : > { %480 = vmatprep.mubr.f32.mxu0 %v1158_v0  ;;  %504 = vmatprep.mubr.f32.mxu1 %v1158_v0 }
  0xa1   : > { %813 = vmatmul.mubr.msk.f32.gmra.mxu0 %vm385_vm0, %v348_v21  ;;  %817 = vmatmul.mubr.msk.f32.gmra.mxu1 %vm385_vm0, %v352_v22 }
  0xa2   : > { %486 = vmatprep.mubr.f32.mxu0 %v1158_v0  ;;  %510 = vmatprep.mubr.f32.mxu1 %v1158_v0 }
  0xa5   : > { %814 = vmatmul.mubr.msk.f32.gmra.mxu0 %vm385_vm0, %v349_v23  ;;  %818 = vmatmul.mubr.msk.f32.gmra.mxu1 %vm385_vm0, %v353_v24 }
  0xa6   : > { %492 = vmatprep.mubr.f32.mxu0 %v1158_v0  ;;  %516 = vmatprep.mubr.f32.mxu1 %v1158_v0 }
  0xa9   : > { %815 = vmatmul.mubr.msk.f32.gmra.mxu0 %vm385_vm0, %v350_v25  ;;  %819 = vmatmul.mubr.msk.f32.gmra.mxu1 %vm385_vm0, %v354_v26 }
 0x15d   : > { %v476_v32 = vpop.f32.mrf.mxu0  ;;  %v500_v33 = vpop.f32.mrf.mxu1 }
 0x15e   : > { %v477_v34 = vadd.f32 %v476_v32, %v378_v31  ;;  %v501_v47 = vadd.f32 %v500_v33, %v378_v31 }
 0x15f   : > { %v478_v35 = vpop.f32.mrf.mxu0  ;;  %v502_v36 = vpop.f32.mrf.mxu1 }
 0x160   : > { %v523_v41 = vmax.f32 %v477_v34, 0.0  ;;  %v479_v58 = vadd.f32 %v478_v35, %v382_v46  ;;  %v527_v59 = vmax.f32 %v501_v47, 0.0  ;;  %v503_v10 = vadd.f32 %v502_v36, %v382_v46 }
 0x161   : > { %v482_v38 = vpop.f32.mrf.mxu0  ;;  %v506_v39 = vpop.f32.mrf.mxu1 }
 0x162   : > { %v483_v40 = vadd.f32 %v482_v38, %v378_v31  ;;  %v538_v52 = vmul.f32 %v820_v44, %v523_v41  ;;  %v507_v57 = vadd.f32 %v506_v39, %v378_v31  ;;  %v542_v9 = vmul.f32 %v820_v44, %v527_v59 }
 0x163   : > { %v484_v42 = vpop.f32.mrf.mxu0  ;;  %v508_v43 = vpop.f32.mrf.mxu1 }
 0x164   : > { %v524_v45 = vmax.f32 %v483_v40, 0.0  ;;  %v485_v55 = vadd.f32 %v484_v42, %v382_v46  ;;  %v546_v3 = vadd.f32 %v538_v52, %v479_v58  ;;  %v528_v5 = vmax.f32 %v507_v57, 0.0 }
 0x165   : > { %v488_v48 = vpop.f32.mrf.mxu0  ;;  %v512_v49 = vpop.f32.mrf.mxu1  ;;  %v509_v15 = vadd.f32 %v508_v43, %v382_v46  ;;  %v550_v21 = vadd.f32 %v542_v9, %v503_v10  ;;  %v613_v10 = vld [vmem:[#allocation8] sm:$0xff] }
 0x166   : > { %v539_v50 = vmul.f32 %v820_v44, %v524_v45  ;;  %v489_v51 = vadd.f32 %v488_v48, %v378_v31  ;;  %v513_v61 = vadd.f32 %v512_v49, %v378_v31  ;;  %v543_v16 = vmul.f32 %v820_v44, %v528_v5 }
 0x167   : > { %v490_v53 = vpop.f32.mrf.mxu0  ;;  %v514_v54 = vpop.f32.mrf.mxu1 }
 0x168   : > { %v525_v56 = vmax.f32 %v489_v51, 0.0  ;;  %v547_v63 = vadd.f32 %v539_v50, %v485_v55  ;;  %v491_v1 = vadd.f32 %v490_v53, %v382_v46  ;;  %v529_v13 = vmax.f32 %v513_v61, 0.0 }
 0x169   : > { %v494_v60 = vpop.f32.mrf.mxu0  ;;  %v518_v62 = vpop.f32.mrf.mxu1  ;;  %v515_v24 = vadd.f32 %v514_v54, %v382_v46  ;;  %v551_v25 = vadd.f32 %v543_v16, %v509_v15  ;;  %v617_v15 = vld [vmem:[#allocation8 + $0x20] sm:$0xff]  ;;  %v618_v16 = vld [vmem:[#allocation8 + $0x28] sm:$0xff] }
 0x16a   : > { %v540_v0 = vmul.f32 %v820_v44, %v525_v56  ;;  %v495_v2 = vadd.f32 %v494_v60, %v378_v31  ;;  %v519_v8 = vadd.f32 %v518_v62, %v378_v31  ;;  %v554_v11 = vadd.f32 %v547_v63, %v546_v3 }
 0x16b   : > { %v496_v4 = vpop.f32.mrf.mxu0  ;;  %v520_v20 = vpop.f32.mrf.mxu1  ;;  %v544_v22 = vmul.f32 %v820_v44, %v529_v13  ;;  %v616_v13 = vld [vmem:[#allocation8 + $0x18] sm:$0xff] }
 0x16c   : > { %v548_v6 = vadd.f32 %v540_v0, %v491_v1  ;;  %v526_v7 = vmax.f32 %v495_v2, 0.0  ;;  %v497_v14 = vadd.f32 %v496_v4, %v382_v46  ;;  %v530_v19 = vmax.f32 %v519_v8, 0.0 }
 0x16d   : > { %v521_v27 = vadd.f32 %v520_v20, %v382_v46  ;;  %v552_v29 = vadd.f32 %v544_v22, %v515_v24  ;;  %v620_v22 = vld [vmem:[#allocation8 + $0x38] sm:$0xff]  ;;  %v630_v24 = vld [vmem:[#allocation10 + $0x8] sm:$0xff] }
 0x16e   : > { %v541_v12 = vmul.f32 %v820_v44, %v526_v7  ;;  %v555_v17 = vadd.f32 %v554_v11, %v548_v6  ;;  %v545_v26 = vmul.f32 %v820_v44, %v530_v19  ;;  %v614_v11 = vld [vmem:[#allocation8 + $0x8] sm:$0xff] }
 0x170   : > { %v549_v18 = vadd.f32 %v541_v12, %v497_v14  ;;  %v553_v31 = vadd.f32 %v545_v26, %v521_v27  ;;  %v615_v12 = vld [vmem:[#allocation8 + $0x10] sm:$0xff] }
 0x172   : > { %v556_v23 = vadd.f32 %v555_v17, %v549_v18  ;;  %v619_v17 = vld [vmem:[#allocation8 + $0x30] sm:$0xff] }
 0x174   : > { %v557_v28 = vadd.f32 %v556_v23, %v550_v21  ;;  %v629_v23 = vld [vmem:[#allocation10] sm:$0xff] }
 0x176   : > { %v558_v30 = vadd.f32 %v557_v28, %v551_v25 }
 0x178   : > { %v559_v32 = vadd.f32 %v558_v30, %v552_v29  ;;  %v632_v30 = vld [vmem:[#allocation10 + $0x18] sm:$0xff] }
 0x17a   : > { %v560_v33 = vadd.f32 %v559_v32, %v553_v31 }
 0x17c   : > { %561 = vadd.xlane.f32.xlu0 %v560_v33 }
 0x205   : > { %v562_v34 = vpop.xlane.xlu0 %561 }
 0x206   : > { %v563_v35 = vrot.slane %v562_v34, 4 }
 0x208   : > { %v564_v36 = vadd.f32 %v563_v35, %v562_v34 }
 0x20a   : > { %v565_v37 = vrot.slane %v564_v36, 2 }
 0x20c   : > { %v566_v38 = vadd.f32 %v565_v37, %v564_v36  ;;  %v634_v36 = vld [vmem:[#allocation10 + $0x28] sm:$0xff]  ;;  %v635_v37 = vld [vmem:[#allocation10 + $0x30] sm:$0xff] }
 0x20e   : > { %v567_v39 = vrot.slane %v566_v38, 1 }
 0x210   : > { %v568_v40 = vadd.f32 %v567_v39, %v566_v38  ;;  %v636_v38 = vld [vmem:[#allocation10 + $0x38] sm:$0xff] }
 0x212   : > { %v570_v41 = vmul.f32 0.00012207031, %v568_v40 }
 0x214   : > { %v571_v42 = vsub.f32 %v546_v3, %v570_v41  ;;  %v572_v43 = vsub.f32 %v547_v63, %v570_v41  ;;  %v573_v45 = vsub.f32 %v548_v6, %v570_v41  ;;  %v574_v44 = vsub.f32 %v549_v18, %v570_v41 }
 0x215   : > { %v575_v48 = vsub.f32 %v550_v21, %v570_v41  ;;  %v576_v51 = vsub.f32 %v551_v25, %v570_v41  ;;  %v577_v54 = vsub.f32 %v552_v29, %v570_v41  ;;  %v578_v57 = vsub.f32 %v553_v31, %v570_v41  ;;  %v631_v29 = vld [vmem:[#allocation10 + $0x10] sm:$0xff]  ;;  %v633_v31 = vld [vmem:[#allocation10 + $0x20] sm:$0xff] }
 0x216   : > { %v579_v46 = vmul.f32 %v571_v42, %v571_v42  ;;  %v580_v47 = vmul.f32 %v572_v43, %v572_v43  ;;  %v581_v49 = vmul.f32 %v573_v45, %v573_v45  ;;  %v582_v52 = vmul.f32 %v574_v44, %v574_v44 }
 0x217   : > { %v583_v55 = vmul.f32 %v575_v48, %v575_v48  ;;  %v584_v58 = vmul.f32 %v576_v51, %v576_v51  ;;  %v585_v60 = vmul.f32 %v577_v54, %v577_v54  ;;  %v586_v62 = vmul.f32 %v578_v57, %v578_v57 }
 0x218   : > { %v587_v50 = vadd.f32 %v580_v47, %v579_v46 }
 0x21a   : > { %v588_v53 = vadd.f32 %v587_v50, %v581_v49 }
 0x21c   : > { %v589_v56 = vadd.f32 %v588_v53, %v582_v52 }
 0x21e   : > { %v590_v59 = vadd.f32 %v589_v56, %v583_v55 }
 0x220   : > { %v591_v61 = vadd.f32 %v590_v59, %v584_v58 }
 0x222   : > { %v592_v63 = vadd.f32 %v591_v61, %v585_v60 }
 0x224   : > { %v593_v0 = vadd.f32 %v592_v63, %v586_v62 }
 0x226   : > { %594 = vadd.xlane.f32.xlu0 %v593_v0 }
 0x2af   : > { %v595_v1 = vpop.xlane.xlu0 %594 }
 0x2b0   : > { %v596_v2 = vrot.slane %v595_v1, 4 }
 0x2b2   : > { %v597_v3 = vadd.f32 %v596_v2, %v595_v1 }
 0x2b4   : > { %v598_v4 = vrot.slane %v597_v3, 2 }
 0x2b6   : > { %v599_v5 = vadd.f32 %v598_v4, %v597_v3 }
 0x2b8   : > { %v600_v6 = vrot.slane %v599_v5, 1 }
 0x2ba   : > { %v601_v7 = vadd.f32 %v600_v6, %v599_v5 }
 0x2bc   : > { %v602_v8 = vmul.f32 0.00012207031, %v601_v7 }
 0x2be   : > { %v603_v9 = vadd.f32 1e-05, %v602_v8 }
 0x2c0   : > { %935 = vrsqrt.f32 %v603_v9 }
 0x2cd   : > { %v936_v14 = vpop.eup %935 }
 0x2ce   : > { %v605_v18 = vmul.f32 %v936_v14, %v571_v42  ;;  %v606_v19 = vmul.f32 %v936_v14, %v572_v43  ;;  %v607_v20 = vmul.f32 %v936_v14, %v573_v45  ;;  %v608_v21 = vmul.f32 %v936_v14, %v574_v44 }
 0x2cf   : > { %v609_v25 = vmul.f32 %v936_v14, %v575_v48  ;;  %v610_v26 = vmul.f32 %v936_v14, %v576_v51  ;;  %v611_v27 = vmul.f32 %v936_v14, %v577_v54  ;;  %v612_v28 = vmul.f32 %v936_v14, %v578_v57 }
 0x2d0   : > { %v621_v32 = vmul.f32 %v613_v10, %v605_v18  ;;  %v622_v33 = vmul.f32 %v614_v11, %v606_v19  ;;  %v623_v34 = vmul.f32 %v615_v12, %v607_v20  ;;  %v624_v35 = vmul.f32 %v616_v13, %v608_v21 }
 0x2d1   : > { %v625_v39 = vmul.f32 %v617_v15, %v609_v25  ;;  %v626_v40 = vmul.f32 %v618_v16, %v610_v26  ;;  %v627_v41 = vmul.f32 %v619_v17, %v611_v27  ;;  %v628_v42 = vmul.f32 %v620_v22, %v612_v28 }
 0x2d2   : > { %v637_v43 = vadd.f32 %v629_v23, %v621_v32  ;;  %v638_v45 = vadd.f32 %v630_v24, %v622_v33  ;;  %v639_v44 = vadd.f32 %v631_v29, %v623_v34  ;;  %v640_v46 = vadd.f32 %v632_v30, %v624_v35 }
 0x2d3   : > { %v641_v47 = vadd.f32 %v633_v31, %v625_v39  ;;  %v642_v48 = vadd.f32 %v634_v36, %v626_v40  ;;  %v643_v49 = vadd.f32 %v635_v37, %v627_v41  ;;  %v644_v50 = vadd.f32 %v636_v38, %v628_v42 }
 0x2d4   : > { %v645_v51 = vmax.f32 %v637_v43, 0.0  ;;  %v646_v52 = vmax.f32 %v638_v45, 0.0  ;;  %v647_v53 = vmax.f32 %v639_v44, 0.0  ;;  %v648_v54 = vmax.f32 %v640_v46, 0.0 }
 0x2d5   : > { %v649_v55 = vmax.f32 %v641_v47, 0.0  ;;  %v650_v56 = vmax.f32 %v642_v48, 0.0  ;;  %v651_v57 = vmax.f32 %v643_v49, 0.0  ;;  %v652_v58 = vmax.f32 %v644_v50, 0.0 }
 0x2d6   : > { %653 = vst [vmem:[%s346_s30] sm:$0xff] %v645_v51  ;;  %654 = vst [vmem:[%s346_s30 + $0x8] sm:$0xff] %v646_v52 }
 0x2d7   : > { %655 = vst [vmem:[%s346_s30 + $0x10] sm:$0xff] %v647_v53  ;;  %656 = vst [vmem:[%s346_s30 + $0x18] sm:$0xff] %v648_v54 }
 0x2d8   : > { %657 = vst [vmem:[%s346_s30 + $0x20] sm:$0xff] %v649_v55  ;;  %658 = vst [vmem:[%s346_s30 + $0x28] sm:$0xff] %v650_v56 }
 0x2d9   : > { %659 = vst [vmem:[%s346_s30 + $0x30] sm:$0xff] %v651_v57  ;;  %660 = vst [vmem:[%s346_s30 + $0x38] sm:$0xff] %v652_v58 }
 0x2da   : > { %1084 = shalt.err (!%p1081_p6)
}
 0x2db   : > { %s1085_s16 = scalar_lea.hbm %s1439_s25, 1024  ;;  %s1089_s29 = scalar_lea.hbm %s1490_s6, 2048 }
 0x2dc   : > { %p1086_p13 = scmp.ne.s32.totalorder %s1439_s25, %s1085_s16  ;;  %p1090_p7 = scmp.lt.s32.totalorder %s1439_s25, %s1490_s6 }
 0x2dd   : > { %p1091_p0 = scmp.lt.s32.totalorder %s1089_s29, %s1085_s16 }
 0x2de   : > { %p1087_p8 = pnand %p1086_p13, %p1518_p1 }
 0x2df   : > { %p1092_p5 = por %p1091_p0, %p1090_p7 }
 0x2e0   : > { %p1088_p11 = pneg %p1087_p8 }
 0x2e2   : > { %p1093_p10 = pnand %p1092_p5, %p1088_p11 }
 0x2e4   : > { %1096 = shalt.err (!%p1093_p10)
}
 0x2e5   : > { %s1160_s8 = smov 128   ;;  %s1161_s19 = smov 8  }
 0x2e6   : > { %862 = dma.vmem_to_hbm [thread:$0]  (%p1518_p1), %s1441_s10, 1024, %s1439_s25, %s662_s15, %s1160_s8, %s1160_s8, %s1161_s19  }
 0x2e7 PF: > { %s690_s30 = sand.u32 1, %s1135_s21   ;;  %p1519_p2 = scmp.ne.s32.totalorder %s1500_s28, 0 }
 0x2e8   : > { %p1520_p3 = scmp.ge.s32.totalorder %s1147_s24, 2  ;;  %s691_s17 = scalar_lea.sflag [#allocation4], %s690_s30 }
 0x2ea   : > { %p882_p9 = pnand %p1520_p3, %p1519_p2 }
 0x2ec   : > { %p883_p12 = pneg %p882_p9 }
 0x2ee   : > { %1130 = dma.done.wait (%p883_p12), %s691_s17, 1024  }
 0x2ef   : > { %1132 = vsyncadd (%p883_p12), %s691_s17, 4294966272  ;;  %p23_p4 = scmp.ge.s32.totalorder %s1272_s7, 4   ;;  %s1521_s21 = smov %s1139_s22 }
 0x2f0   : > { %s1522_s22 = smov %s1143_s23  ;;  %s1523_s23 = smov %s1293_s13 }
 0x2f1   : > { %s1524_s24 = smov %s1272_s7  ;;  %25 = sbr.rel (!%p23_p4) target bundleno = 12 (0xc), region = 114 }
 0x2f6   :  { %696 = vsyncpa [#allocation3], 1 }
 0x2f7   :  { %698 = vsyncpa [#allocation3 + $0x1], 1 }
 0x2f8   :  { %699 = vsyncpa [#allocation6], 1 }
 0x2f9   :  { %701 = vsyncpa [#allocation6 + $0x1], 1 }
 0x2fa   :  { %702 = vsyncpa [#allocation9], 1 }
 0x2fb   :  { %703 = vsyncpa [#allocation4], 1 }
 0x2fc   :  { %705 = vsyncpa [#allocation4 + $0x1], 1 }

</bundles_post_ra>
